<compile_context>
chip_gen: v5e
topology: v5e:2x2
jax: 0.10.0
libtpu: 0.0.40
codegen_flags: <defaults>
</compile_context>

<pallas_src>
import jax
import jax.numpy as jnp
from jax.experimental import pallas as pl
from jax.experimental.pallas import tpu as pltpu

LANE = 128  # TPU lane width; hidden and logits dims are padded to this.


# --------------------------------------------------------------------------
# Kernel
# --------------------------------------------------------------------------
def mlp_kernel(x_ref, w1_ref, b1_ref, w2_ref, b2_ref, w3_ref, b3_ref, o_ref):
    # In-kernel f32 -> bf16 cast of the x tile (VPU work, hidden under DMA).
    x = x_ref[...].astype(jnp.bfloat16)

    # Layer 1: bf16 x bf16 -> f32 MXU accumulate; f32 bias + ReLU on the VPU.
    h1 = jnp.dot(x, w1_ref[...], preferred_element_type=jnp.float32)
    h1 = jnp.maximum(h1 + b1_ref[...], 0.0)

    # Layer 2: lane-dense (tb, 128) bf16 dot with f32 accumulation.
    h2 = jnp.dot(h1.astype(jnp.bfloat16), w2_ref[...],
                 preferred_element_type=jnp.float32)
    h2 = jnp.maximum(h2 + b2_ref[...], 0.0)

    # Layer 3: logits into the lane-dense padded slab, bf16 writeback.
    out = jnp.dot(h2.astype(jnp.bfloat16), w3_ref[...],
                  preferred_element_type=jnp.float32)
    o_ref[...] = (out + b3_ref[...]).astype(o_ref.dtype)


# --------------------------------------------------------------------------
# Helpers
# --------------------------------------------------------------------------
def _round_up(n, m):
    return ((n + m - 1) // m) * m


def _vmem_capacity_bytes():
    """Physical VMEM of the current generation (fallback = v7x per-TC 64 MiB,
    which is safe on every generation)."""
    try:
        info = pltpu.get_tpu_info()
        cap = getattr(info, "vmem_capacity_bytes", None)
        if cap:
            return int(cap)
    except Exception:
        pass
    return 64 << 20


def _choose_block_batch(batch, input_size, out_pad, tile_budget):
    """Pick the batch tile tb (multiple of 16) that
       * divides the 16-aligned batch (no ragged tail / no big wrapper pad),
       * fits double-buffered f32 x + bf16 out tiles in `tile_budget`,
       * leaves >= 2 grid steps whenever the batch allows it (v7x megacore).
    Returns (tb, padded_batch)."""
    padded_batch = _round_up(batch, 16)
    m = padded_batch // 16

    # double-buffered f32 x tile + double-buffered bf16 output tile, per row
    per_row = 2 * input_size * 4 + 2 * out_pad * 2
    max_rows = max(16, (tile_budget // per_row) // 16 * 16)

    cap = max(1, max_rows // 16)
    if m >= 2:
        cap = min(cap, m // 2)          # ensure grid[0] >= 2 for megacore
    d = max(1, min(cap, m))
    while m % d != 0:                   # largest divisor of m that fits
        d -= 1
    return 16 * d, padded_batch


# --------------------------------------------------------------------------
# Parameter preparation (one-time glue; keeps the per-call path cheap)
# --------------------------------------------------------------------------
def prepare_params(params):
    """PyTorch layout (w: (out, in), b: (out,)) -> kernel layout:
    (in, out) weights / (1, out) biases, hidden and logits dims zero-padded to
    multiples of LANE, weights cast to bf16 (biases stay f32)."""
    input_size = params["w1"].shape[1]
    hidden = params["w1"].shape[0]
    output_size = params["w3"].shape[0]

    hid_pad = _round_up(max(hidden, LANE), LANE)
    out_pad = _round_up(max(output_size, LANE), LANE)

    def pad_to(a, shape):
        return jnp.pad(a, [(0, s - d) for s, d in zip(shape, a.shape)])

    w1_t = pad_to(params["w1"].T.astype(jnp.float32),
                  (input_size, hid_pad)).astype(jnp.bfloat16)
    b1 = pad_to(params["b1"].reshape(1, -1).astype(jnp.float32), (1, hid_pad))
    w2_t = pad_to(params["w2"].T.astype(jnp.float32),
                  (hid_pad, hid_pad)).astype(jnp.bfloat16)
    b2 = pad_to(params["b2"].reshape(1, -1).astype(jnp.float32), (1, hid_pad))
    w3_p = pad_to(params["w3"].T.astype(jnp.float32),
                  (hid_pad, out_pad)).astype(jnp.bfloat16)
    b3_p = pad_to(params["b3"].reshape(1, -1).astype(jnp.float32), (1, out_pad))

    return {
        "w1_t": w1_t, "b1": b1,
        "w2_t": w2_t, "b2": b2,
        "w3_p": w3_p, "b3_p": b3_p,
        "output_size": output_size,
    }


# --------------------------------------------------------------------------
# Forward pass
# --------------------------------------------------------------------------
def neural_net_forward(x, prep):
    """x: (batch, input_size) f32.  prep: output of prepare_params."""
    batch, input_size = x.shape
    hid_pad = prep["w1_t"].shape[1]
    out_pad = prep["w3_p"].shape[1]
    output_size = prep["output_size"]

    weights = (prep["w1_t"], prep["b1"], prep["w2_t"], prep["b2"],
               prep["w3_p"], prep["b3_p"])
    weight_bytes = sum(int(a.size) * a.dtype.itemsize for a in weights)

    # Generation-aware VMEM ceiling (leave headroom for compiler scratch):
    # v7x 64 MiB -> ~56 MiB, v5e/v6e 128 MiB -> ~112 MiB.
    vmem_cap = _vmem_capacity_bytes()
    vmem_ceiling = vmem_cap - max(8 << 20, vmem_cap // 8)
    tile_budget = max(vmem_ceiling - 2 * weight_bytes - (2 << 20), 2 << 20)

    tb, padded_batch = _choose_block_batch(batch, input_size, out_pad,
                                           tile_budget)
    if padded_batch != batch:
        # Only hit when batch is not 16-aligned (<=15 extra rows); rows are
        # discarded by the final slice.
        x = jnp.pad(x, ((0, padded_batch - batch), (0, 0)))

    grid = (padded_batch // tb,)

    tile_bytes = 2 * tb * input_size * 4 + 2 * tb * out_pad * 2
    needed = tile_bytes + 2 * weight_bytes + (2 << 20)
    vmem_limit = int(min(max(needed, 16 << 20), vmem_ceiling))

    flops = 2 * padded_batch * (input_size * hid_pad
                                + hid_pad * hid_pad
                                + hid_pad * out_pad)
    bytes_accessed = (padded_batch * input_size * 4      # x (f32)
                      + weight_bytes                      # resident weights
                      + padded_batch * out_pad * 2)       # output (bf16)

    resident = lambda a: pl.BlockSpec(a.shape, lambda i: (0,) * a.ndim)

    out = pl.pallas_call(
        mlp_kernel,
        out_shape=jax.ShapeDtypeStruct((padded_batch, out_pad), jnp.bfloat16),
        grid=grid,
        in_specs=[
            pl.BlockSpec((tb, input_size), lambda i: (i, 0)),   # x tile (f32)
            resident(prep["w1_t"]),
            resident(prep["b1"]),
            resident(prep["w2_t"]),
            resident(prep["b2"]),
            resident(prep["w3_p"]),
            resident(prep["b3_p"]),
        ],
        out_specs=pl.BlockSpec((tb, out_pad), lambda i: (i, 0)),
        compiler_params=pltpu.CompilerParams(
            dimension_semantics=("parallel",),
            vmem_limit_bytes=vmem_limit,
        ),
        cost_estimate=pl.CostEstimate(
            flops=flops, transcendentals=0, bytes_accessed=bytes_accessed),
    )(x, prep["w1_t"], prep["b1"], prep["w2_t"], prep["b2"],
      prep["w3_p"], prep["b3_p"])

    # Tiny epilogue: drop padded rows/columns, return f32 like the PyTorch
    # module (touches only batch x out_pad bf16 + batch x output_size f32).
    return out[:batch, :output_size].astype(jnp.float32)


# --------------------------------------------------------------------------
# Init (mimics nn.Linear's U(-1/sqrt(fan_in), 1/sqrt(fan_in)), PyTorch layout)
# --------------------------------------------------------------------------
def init_params(key, input_size, hidden_size, output_size):
    ks = jax.random.split(key, 6)

    def linear(kw, kb, fan_in, fan_out):
        bound = 1.0 / jnp.sqrt(fan_in)
        w = jax.random.uniform(kw, (fan_out, fan_in), jnp.float32, -bound, bound)
        b = jax.random.uniform(kb, (fan_out,), jnp.float32, -bound, bound)
        return w, b

    w1, b1 = linear(ks[0], ks[1], input_size, hidden_size)
    w2, b2 = linear(ks[2], ks[3], hidden_size, hidden_size)
    w3, b3 = linear(ks[4], ks[5], hidden_size, output_size)
    return {"w1": w1, "b1": b1, "w2": w2, "b2": b2, "w3": w3, "b3": b3}


if __name__ == "__main__":
    # Shapes implied by train.py: input_size = bag-of-words vocab length,
    # hidden_size = 8, output_size = number of tags.  batch=32 (16-aligned)
    # avoids the pad path and exercises grid=(2,) megacore sharding.
    batch = 32
    input_size = 64
    hidden_size = 8
    output_size = 6

    key = jax.random.PRNGKey(0)
    k_x, k_p = jax.random.split(key)

    x = jax.random.uniform(k_x, (batch, input_size), jnp.float32)
    params = init_params(k_p, input_size, hidden_size, output_size)
    prep = prepare_params(params)

    out = neural_net_forward(x, prep)
    out = jax.block_until_ready(out)

    # Pure-JAX f32 reference of the same forward pass.  The kernel streams
    # all three layers (and the output) in bf16 with f32 accumulation, so the
    # tolerance is loosened accordingly.
    h = jnp.maximum(x @ params["w1"].T + params["b1"], 0.0)
    h = jnp.maximum(h @ params["w2"].T + params["b2"], 0.0)
    ref = h @ params["w3"].T + params["b3"]

    assert out.shape == (batch, output_size)
    assert jnp.allclose(out, ref, atol=5e-2, rtol=5e-2), "mismatch vs reference"

    print("KERNEL_OK")
</pallas_src>

<mosaic_0001>
module attributes {stable_mosaic.version = 11 : i64} {
  func.func @mlp_kernel(%arg0: i32, %arg1: memref<16x64xf32, #tpu.memory_space<vmem>>, %arg2: memref<64x128xbf16, #tpu.memory_space<vmem>>, %arg3: memref<1x128xf32, #tpu.memory_space<vmem>>, %arg4: memref<128x128xbf16, #tpu.memory_space<vmem>>, %arg5: memref<1x128xf32, #tpu.memory_space<vmem>>, %arg6: memref<128x128xbf16, #tpu.memory_space<vmem>>, %arg7: memref<1x128xf32, #tpu.memory_space<vmem>>, %arg8: memref<16x128xbf16, #tpu.memory_space<vmem>>) attributes {dimension_semantics = [#tpu.dimension_semantics<parallel>], iteration_bounds = array<i64: 2>, scalar_prefetch = 0 : i64, scratch_operands = 0 : i64, tpu.core_type = #tpu.core_type<tc>, window_params = [{transform_indices = @transform_0, window_bounds = array<i64: 16, 64>}, {pipeline_mode = #tpu.pipeline_mode<synchronous>, transform_indices = @transform_1, window_bounds = array<i64: 64, 128>}, {pipeline_mode = #tpu.pipeline_mode<synchronous>, transform_indices = @transform_2, window_bounds = array<i64: 1, 128>}, {pipeline_mode = #tpu.pipeline_mode<synchronous>, transform_indices = @transform_3, window_bounds = array<i64: 128, 128>}, {pipeline_mode = #tpu.pipeline_mode<synchronous>, transform_indices = @transform_4, window_bounds = array<i64: 1, 128>}, {pipeline_mode = #tpu.pipeline_mode<synchronous>, transform_indices = @transform_5, window_bounds = array<i64: 128, 128>}, {pipeline_mode = #tpu.pipeline_mode<synchronous>, transform_indices = @transform_6, window_bounds = array<i64: 1, 128>}, {transform_indices = @transform_7, window_bounds = array<i64: 16, 128>}]} {
    %c0 = arith.constant 0 : index
    %c0_0 = arith.constant 0 : index
    %0 = vector.load %arg1[%c0, %c0_0] : memref<16x64xf32, #tpu.memory_space<vmem>>, vector<16x64xf32>
    %1 = arith.truncf %0 : vector<16x64xf32> to vector<16x64xbf16>
    %c0_1 = arith.constant 0 : index
    %c0_2 = arith.constant 0 : index
    %2 = vector.load %arg2[%c0_1, %c0_2] : memref<64x128xbf16, #tpu.memory_space<vmem>>, vector<64x128xbf16>
    %cst = arith.constant dense<0.000000e+00> : vector<16x128xf32>
    %3 = tpu.matmul %1, %2, %cst {dimension_numbers = #tpu.dot_dimension_numbers<[1], [0], [0], [1], [0, 0, 1, 1], [], []>} : vector<16x64xbf16>, vector<64x128xbf16>, vector<16x128xf32> -> vector<16x128xf32>
    %c0_3 = arith.constant 0 : index
    %c0_4 = arith.constant 0 : index
    %4 = vector.load %arg3[%c0_3, %c0_4] : memref<1x128xf32, #tpu.memory_space<vmem>>, vector<1x128xf32>
    %5 = vector.broadcast %4 : vector<1x128xf32> to vector<16x128xf32>
    %6 = arith.addf %3, %5 : vector<16x128xf32>
    %cst_5 = arith.constant 0.000000e+00 : f32
    %7 = vector.broadcast %cst_5 : f32 to vector<16x128xf32>
    %8 = arith.maximumf %6, %7 : vector<16x128xf32>
    %9 = arith.truncf %8 : vector<16x128xf32> to vector<16x128xbf16>
    %c0_6 = arith.constant 0 : index
    %c0_7 = arith.constant 0 : index
    %10 = vector.load %arg4[%c0_6, %c0_7] : memref<128x128xbf16, #tpu.memory_space<vmem>>, vector<128x128xbf16>
    %cst_8 = arith.constant dense<0.000000e+00> : vector<16x128xf32>
    %11 = tpu.matmul %9, %10, %cst_8 {dimension_numbers = #tpu.dot_dimension_numbers<[1], [0], [0], [1], [0, 0, 1, 1], [], []>} : vector<16x128xbf16>, vector<128x128xbf16>, vector<16x128xf32> -> vector<16x128xf32>
    %c0_9 = arith.constant 0 : index
    %c0_10 = arith.constant 0 : index
    %12 = vector.load %arg5[%c0_9, %c0_10] : memref<1x128xf32, #tpu.memory_space<vmem>>, vector<1x128xf32>
    %13 = vector.broadcast %12 : vector<1x128xf32> to vector<16x128xf32>
    %14 = arith.addf %11, %13 : vector<16x128xf32>
    %cst_11 = arith.constant 0.000000e+00 : f32
    %15 = vector.broadcast %cst_11 : f32 to vector<16x128xf32>
    %16 = arith.maximumf %14, %15 : vector<16x128xf32>
    %17 = arith.truncf %16 : vector<16x128xf32> to vector<16x128xbf16>
    %c0_12 = arith.constant 0 : index
    %c0_13 = arith.constant 0 : index
    %18 = vector.load %arg6[%c0_12, %c0_13] : memref<128x128xbf16, #tpu.memory_space<vmem>>, vector<128x128xbf16>
    %cst_14 = arith.constant dense<0.000000e+00> : vector<16x128xf32>
    %19 = tpu.matmul %17, %18, %cst_14 {dimension_numbers = #tpu.dot_dimension_numbers<[1], [0], [0], [1], [0, 0, 1, 1], [], []>} : vector<16x128xbf16>, vector<128x128xbf16>, vector<16x128xf32> -> vector<16x128xf32>
    %c0_15 = arith.constant 0 : index
    %c0_16 = arith.constant 0 : index
    %20 = vector.load %arg7[%c0_15, %c0_16] : memref<1x128xf32, #tpu.memory_space<vmem>>, vector<1x128xf32>
    %21 = vector.broadcast %20 : vector<1x128xf32> to vector<16x128xf32>
    %22 = arith.addf %19, %21 : vector<16x128xf32>
    %23 = arith.truncf %22 : vector<16x128xf32> to vector<16x128xbf16>
    %c0_17 = arith.constant 0 : index
    %c0_18 = arith.constant 0 : index
    %24 = vector.load %arg8[%c0_17, %c0_18] : memref<16x128xbf16, #tpu.memory_space<vmem>>, vector<16x128xbf16>
    tpu.vector_store %arg8[%c0_17, %c0_18], %23 {strides = array<i32>} : memref<16x128xbf16, #tpu.memory_space<vmem>>, vector<16x128xbf16>,
    return
  }
  func.func @transform_0(%arg0: i32) -> (i32, i32) {
    %c0_i32 = arith.constant 0 : i32
    %c0_i32_0 = arith.constant 0 : i32
    return %arg0, %c0_i32 : i32, i32
  }
  func.func @transform_1(%arg0: i32) -> (i32, i32) {
    %c0_i32 = arith.constant 0 : i32
    %c0_i32_0 = arith.constant 0 : i32
    %c0_i32_1 = arith.constant 0 : i32
    return %c0_i32, %c0_i32_0 : i32, i32
  }
  func.func @transform_2(%arg0: i32) -> (i32, i32) {
    %c0_i32 = arith.constant 0 : i32
    %c0_i32_0 = arith.constant 0 : i32
    %c0_i32_1 = arith.constant 0 : i32
    return %c0_i32, %c0_i32_0 : i32, i32
  }
  func.func @transform_3(%arg0: i32) -> (i32, i32) {
    %c0_i32 = arith.constant 0 : i32
    %c0_i32_0 = arith.constant 0 : i32
    %c0_i32_1 = arith.constant 0 : i32
    return %c0_i32, %c0_i32_0 : i32, i32
  }
  func.func @transform_4(%arg0: i32) -> (i32, i32) {
    %c0_i32 = arith.constant 0 : i32
    %c0_i32_0 = arith.constant 0 : i32
    %c0_i32_1 = arith.constant 0 : i32
    return %c0_i32, %c0_i32_0 : i32, i32
  }
  func.func @transform_5(%arg0: i32) -> (i32, i32) {
    %c0_i32 = arith.constant 0 : i32
    %c0_i32_0 = arith.constant 0 : i32
    %c0_i32_1 = arith.constant 0 : i32
    return %c0_i32, %c0_i32_0 : i32, i32
  }
  func.func @transform_6(%arg0: i32) -> (i32, i32) {
    %c0_i32 = arith.constant 0 : i32
    %c0_i32_0 = arith.constant 0 : i32
    %c0_i32_1 = arith.constant 0 : i32
    return %c0_i32, %c0_i32_0 : i32, i32
  }
  func.func @transform_7(%arg0: i32) -> (i32, i32) {
    %c0_i32 = arith.constant 0 : i32
    %c0_i32_0 = arith.constant 0 : i32
    return %arg0, %c0_i32 : i32, i32
  }
}

</mosaic_0001>

<bundles_post_ra>
// kernel: tpu_custom_call.1
= control target key start
LH: loop header
LB: loop body
LE: loop exit
PB: predicated region body
PF: predicated region fallthrough
CT: control target
= control target key end

     0   :  { %s1330_s0 = inlined_call_operand.hbm [shape: f32[32,64], index: 0, kind: input, shape index: {}]   ;;  %s1331_s1 = inlined_call_operand.hbm [shape: bf16[64,128], index: 1, kind: input, shape index: {}]   ;;  %s1332_s2 = inlined_call_operand.vmem [shape: f32[1,128], index: 2, kind: input, shape index: {}]   ;;  %s1333_s3 = inlined_call_operand.hbm [shape: bf16[128,128], index: 3, kind: input, shape index: {}]   ;;  %s1334_s4 = inlined_call_operand.vmem [shape: f32[1,128], index: 4, kind: input, shape index: {}]   ;;  %s1335_s5 = inlined_call_operand.hbm [shape: bf16[128,128], index: 5, kind: input, shape index: {}]   ;;  %s1336_s6 = inlined_call_operand.vmem [shape: f32[1,128], index: 6, kind: input, shape index: {}]   ;;  %s1337_s7 = inlined_call_operand.hbm [shape: bf16[32,128], index: 7, kind: output, shape index: {}]  }
   0x1   :  { %1338 = sst [smem:[#allocation15_spill]] %s1331_s1 }
   0x2   :  { %12 = vsyncpa [#allocation3], 0 }
   0x3   :  { %14 = vsyncpa [#allocation3 + $0x1], 0 }
   0x4   :  { %15 = vsyncpa [#allocation6], 0 }
   0x5   :  { %16 = vsyncpa [#allocation9], 0 }
   0x6   :  { %17 = vsyncpa [#allocation4], 0 }
   0x7   :  { %19 = vsyncpa [#allocation4 + $0x1], 0  ;;  %s1160_s24 = smov 0   ;;  %s1162_s25 = smov 0  }
   0x8   :  { %s1164_s26 = smov 0   ;;  %s1166_s27 = smov 0  }
   0x9 LB: > { %s1181_s28 = sadd.s32 4294967295, %s1109_s27   ;;  %s701_s29 = sadd.s32 4294967294, %s1109_s27   ;;  %s1109_s27 = sphi %s1166_s27, %s1350_s27   ;;  %s1105_s26 = sphi %s1164_s26, %s1349_s26   ;;  %s1101_s25 = sphi %s1162_s25, %s1348_s25   ;;  %s1097_s24 = sphi %s1160_s24, %s1347_s24  }
   0xa   : > { %p45_p0 = scmp.ne.s32.totalorder %s1101_s25, %s1097_s24  ;;  %p46_p1 = scmp.eq.s32.totalorder %s1181_s28, 0 }
   0xb   : > { %p195_p2 = scmp.eq.s32.totalorder %s1181_s28, 1  ;;  %p201_p3 = scmp.eq.s32.totalorder %s701_s29, 1 }
   0xc   : > { %p1190_p4 = por %p46_p1, %p45_p0  ;;  %p702_p5 = scmp.ge.s32.totalorder %s1109_s27, 1 }
   0xd   : > { %p1195_p6 = por %p201_p3, %p45_p0  ;;  %p208_p7 = scmp.lt.s32.totalorder %s1109_s27, 3 }
   0xe   : > { %s1341_s1 = sld [smem:[#allocation15_spill]]  ;;  %s1111_s13 = smov [#allocation5]  }
   0xf   : > { %p1203_p8 = pnand %p702_p5, %p208_p7  ;;  %s221_s14 = sshll.u32 %s1111_s13, 4  ;;  %s222_s14 = int_to_ptr.vmem [resolvable:$true] %s221_s14 }
  0x10   : > { %s236_s18 = sshll.u32 %s1333_s3, 4  ;;  %s1112_s19 = smov 64   ;;  %s237_s18 = int_to_ptr.hbm [resolvable:$true] %s236_s18 }
  0x11   : > { %p845_p9 = pneg %p1203_p8  ;;  %s1113_s20 = smov 4  }
  0x12   : > { %s1114_s21 = smov [#allocation7]   ;;  %s253_s9 = sshll.u32 %s1335_s5, 4  ;;  %s254_s9 = int_to_ptr.hbm [resolvable:$true] %s253_s9 }
  0x13   : > { %p1211_p10 = pnand %p845_p9, %p46_p1  ;;  %s238_s22 = sshll.u32 %s1114_s21, 4  ;;  %s239_s22 = int_to_ptr.vmem [resolvable:$true] %s238_s22 }
  0x14   : > { %s219_s11 = sshll.u32 %s1341_s1, 4  ;;  %s1115_s10 = smov [#allocation8]   ;;  %s220_s11 = int_to_ptr.hbm [resolvable:$true] %s219_s11 }
  0x15   : > { %848 = dma.hbm_to_vmem [thread:$0]  (!%p1211_p10), %s220_s11, 512, %s222_s14, [#allocation6], %s1112_s19, %s1112_s19, %s1113_s20  }
  0x16   : > { %851 = dma.hbm_to_vmem [thread:$0]  (!%p1211_p10), %s237_s18, 1024, %s239_s22, [#allocation6], %s1112_s19, %s1112_s19, %s1113_s20  }
  0x17   : > { %s255_s13 = sshll.u32 %s1115_s10, 4  ;;  %s1227_s11 = sadd.s32 1, %s1109_s27   ;;  %s256_s13 = int_to_ptr.vmem [resolvable:$true] %s255_s13 }
  0x18   : > { %854 = dma.hbm_to_vmem [thread:$0]  (!%p1211_p10), %s254_s9, 1024, %s256_s13, [#allocation9], %s1112_s19, %s1112_s19, %s1113_s20  }
  0x19   : > { %s29_s14 = ssub.s32 %s1109_s27, %s1227_s11  ;;  %s32_s16 = sadd.s32 1, %s1105_s26 }
  0x1a   : > { %p30_p12 = scmp.eq.s32.totalorder %s29_s14, 0  ;;  %p39_p13 = scmp.ne.s32.totalorder %s1105_s26, %s1101_s25 }
  0x1b   : > { %p40_p0 = scmp.eq.s32.totalorder %s1109_s27, 0  ;;  %p866_p3 = scmp.lt.s32.totalorder %s1109_s27, 2 }
  0x1c   : > { %s1239_s17 = scalar_select %p30_p12, %s1105_s26, %s32_s16  }
  0x1d   : > { %p41_p5 = por %p40_p0, %p39_p13  ;;  %p1243_p7 = por %p195_p2, %p39_p13 }
  0x1e   : > { %s272_s21 = sand.u32 1, %s1105_s26   ;;  %s802_s22 = sshll.u32 %s1109_s27, 4 }
  0x1f   : > { %s707_s15 = sshll.u32 %s272_s21, 4  ;;  %s281_s20 = scalar_lea.hbm %s1330_s0, %s802_s22 }
  0x20   : > { %s282_s29 = sshll.u32 %s281_s20, 4  ;;  %s276_s9 = scalar_lea.vmem [#allocation2], %s707_s15  ;;  %s283_s29 = int_to_ptr.hbm [resolvable:$true] %s282_s29 }
  0x21   : > { %s284_s10 = sshll.u32 %s276_s9, 4  ;;  %p1254_p9 = pnand %p866_p3, %p41_p5  ;;  %s285_s10 = int_to_ptr.vmem [resolvable:$true] %s284_s10 }
  0x22   : > { %s273_s14 = scalar_lea.sflag [#allocation3], %s272_s21  ;;  %s1005_s16 = sshra.s32 %s283_s29, 4  ;;  %s1006_s16 = int_to_ptr.hbm [resolvable:$true] %s1005_s16 }
  0x23   : > { %s1007_s1 = scalar_lea.hbm %s1006_s16, 16  ;;  %p1009_p10 = pneg %p1254_p9 }
  0x24   : > { %p1008_p2 = scmp.ne.s32.totalorder %s1006_s16, %s1007_s1  ;;  %s1012_s23 = scalar_lea.hbm %s1330_s0, 32 }
  0x25   : > { %p1013_p0 = scmp.lt.s32.totalorder %s1006_s16, %s1330_s0  ;;  %p1014_p3 = scmp.lt.s32.totalorder %s1012_s23, %s1007_s1 }
  0x26   : > { %p1010_p12 = pnand %p1009_p10, %p1008_p2 }
  0x27   : > { %p1015_p5 = por %p1014_p3, %p1013_p0 }
  0x28   : > { %p1011_p13 = pneg %p1010_p12 }
  0x2a   : > { %p1016_p11 = pnand %p1015_p5, %p1011_p13 }
  0x2c   : > { %1019 = shalt.err (!%p1016_p11)
}
  0x2d   : > { %s1116_s21 = smov 128   ;;  %s1117_s9 = smov 8  }
  0x2e   : > { %858 = dma.hbm_to_vmem [thread:$0]  (!%p1254_p9), %s283_s29, 256, %s285_s10, %s273_s14, %s1116_s21, %s1116_s21, %s1117_s9  }
  0x2f   : > { %296 = sbr.rel (%p1203_p8) target bundleno = 501 (0x1f5), region = 48  ;;  %s1271_s22 = sand.u32 (!%p1203_p8), 1, %s1101_s25  }
  0x30   : > { %s711_s15 = sshll.u32 (!%p1203_p8), %s1271_s22, 4  ;;  %s299_s16 = scalar_lea.sflag (!%p1203_p8), [#allocation3], %s1271_s22 }
  0x31   : > { %s302_s1 = scalar_lea.vmem (!%p1203_p8), [#allocation2], %s711_s15 }
  0x34   : > { %1080 = dma.done.wait (%p1190_p4), %s299_s16, 256  }
  0x35   : > { %1082 = vsyncadd (%p1190_p4), %s299_s16, 4294967040 }
  0x36   : > { %1084 = dma.done.wait (%p46_p1), [#allocation6], 1536  }
  0x37   : > { %1086 = vsyncadd (%p46_p1), [#allocation6], 4294965760 }
  0x38   : > { %1088 = dma.done.wait (%p46_p1), [#allocation9], 1024  }
  0x39   : > { %1090 = vsyncadd (%p46_p1), [#allocation9], 4294966272  ;;  %v806_v0 = vld [vmem:[#allocation5 + $0x18] sm:$0xff]  ;;  %v805_v1 = vld [vmem:[#allocation5 + $0x10] sm:$0xff]  ;;  %vm391_vm0 = vcmask 523264   ;;  %s715_s13 = sshll.u32 %s1271_s22, 3 }
  0x3a   : > { %399 = vmatpush.bf16.msra.mxu0 %v806_v0  ;;  %v814_v2 = vld [vmem:[#allocation7 + $0x38] sm:$0xff]  ;;  %v813_v3 = vld [vmem:[#allocation7 + $0x30] sm:$0xff]  ;;  %v804_v4 = vld [vmem:[#allocation5 + $0x8] sm:$0xff]  ;;  %s823_s14 = sshll.u32 %s1181_s28, 3  ;;  %s348_s15 = scalar_lea.vmem [#allocation10], %s715_s13 }
  0x3b   : > { %480 = vmatpush.bf16.msra.mxu1 %v814_v2  ;;  %v812_v5 = vld [vmem:[#allocation7 + $0x28] sm:$0xff]  ;;  %v803_v6 = vld [vmem:[#allocation5] sm:$0xff]  ;;  %v810_v11 = vld [vmem:[#allocation7 + $0x18] sm:$0xff]  ;;  %s595_s20 = scalar_lea.hbm %s1337_s7, %s823_s14  ;;  %s596_s16 = sshll.u32 %s348_s15, 4  ;;  %s597_s16 = int_to_ptr.vmem [resolvable:$true] %s596_s16 }
  0x3c   : > { %v352_v7 = vld [vmem:[%s302_s1] sm:$0xff]  ;;  %v353_v8 = vld [vmem:[%s302_s1 + $0x8] sm:$0xff]  ;;  %s598_s1 = sshll.u32 %s595_s20, 4  ;;  %s584_s28 = scalar_lea.sflag [#allocation4], %s1271_s22  ;;  %s599_s1 = int_to_ptr.hbm [resolvable:$true] %s598_s1 }
  0x3d   : > { %v811_v9 = vld [vmem:[#allocation7 + $0x20] sm:$0xff]  ;;  %v354_v10 = vpack.c.bf16 %v353_v8, %v352_v7  ;;  %v809_v12 = vld [vmem:[#allocation7 + $0x10] sm:$0xff]  ;;  %v808_v13 = vld [vmem:[#allocation7 + $0x8] sm:$0xff]  ;;  %s1049_s30 = sshra.s32 %s599_s1, 4  ;;  %s1055_s13 = scalar_lea.hbm %s1337_s7, 16  ;;  %s1050_s30 = int_to_ptr.hbm [resolvable:$true] %s1049_s30 }
  0x3e   : > { %400 = vmatpush.bf16.msra.mxu0 %v805_v1  ;;  %v807_v14 = vld [vmem:[#allocation7] sm:$0xff]  ;;  %v822_v15 = vld [vmem:[#allocation8 + $0x38] sm:$0xff]  ;;  %v821_v16 = vld [vmem:[#allocation8 + $0x30] sm:$0xff]  ;;  %s1051_s12 = scalar_lea.hbm %s1050_s30, 8  ;;  %p1056_p11 = scmp.lt.s32.totalorder %s1050_s30, %s1337_s7 }
  0x3f   : > { %481 = vmatpush.bf16.msra.mxu1 %v813_v3  ;;  %565 = vmatpush.bf16.msra.mxu2 %v822_v15  ;;  %v820_v17 = vld [vmem:[#allocation8 + $0x28] sm:$0xff]  ;;  %v819_v18 = vld [vmem:[#allocation8 + $0x20] sm:$0xff]  ;;  %v818_v27 = vld [vmem:[#allocation8 + $0x18] sm:$0xff]  ;;  %p1052_p1 = scmp.ne.s32.totalorder %s1050_s30, %s1051_s12  ;;  %p1057_p9 = scmp.lt.s32.totalorder %s1055_s13, %s1051_s12 }
  0x40   : > { %v912_v20 = vld [vmem:[%s1332_s2] ss:$0 sm:$0xff]  ;;  %v817_v28 = vld [vmem:[#allocation8 + $0x10] sm:$0xff]  ;;  %v816_v29 = vld [vmem:[#allocation8 + $0x8] sm:$0xff] }
  0x41   : > { %v815_v30 = vld [vmem:[#allocation8] sm:$0xff]  ;;  %p1053_p4 = pnand %p1052_p1, %p1243_p7  ;;  %p1058_p2 = por %p1057_p9, %p1056_p11 }
  0x42   : > { %401 = vmatpush.bf16.msra.mxu0 %v804_v4  ;;  %v913_v32 = vld [vmem:[%s1334_s4] ss:$0 sm:$0xff] }
  0x43   : > { %482 = vmatpush.bf16.msra.mxu1 %v812_v5  ;;  %566 = vmatpush.bf16.msra.mxu2 %v821_v16  ;;  %v914_v40 = vld [vmem:[%s1336_s6] ss:$0 sm:$0xff]  ;;  %p1054_p8 = pneg %p1053_p4 }
  0x45   : > { %p1059_p10 = pnand %p1058_p2, %p1054_p8 }
  0x46   : > { %402 = vmatpush.bf16.msra.mxu0 %v803_v6 }
  0x47   : > { %483 = vmatpush.bf16.msra.mxu1 %v811_v9  ;;  %567 = vmatpush.bf16.msra.mxu2 %v820_v17 }
  0x49   : > { %732 = vmatmul.msk.bf16.vlgmr.msra.gmra.mxu0 %vm391_vm0, %v354_v10 }
  0x4b   : > { %484 = vmatpush.bf16.msra.mxu1 %v810_v11  ;;  %568 = vmatpush.bf16.msra.mxu2 %v819_v18 }
  0x4f   : > { %485 = vmatpush.bf16.msra.mxu1 %v809_v12  ;;  %569 = vmatpush.bf16.msra.mxu2 %v818_v27 }
  0x53   : > { %486 = vmatpush.bf16.msra.mxu1 %v808_v13  ;;  %570 = vmatpush.bf16.msra.mxu2 %v817_v28 }
  0x57   : > { %487 = vmatpush.bf16.msra.mxu1 %v807_v14  ;;  %571 = vmatpush.bf16.msra.mxu2 %v816_v29 }
  0x5b   : > { %572 = vmatpush.bf16.msra.mxu2 %v815_v30 }
  0xc6   : > { %v404_v19 = vpop.f32.mrf.mxu0 }
  0xc7   : > { %v405_v21 = vadd.f32 %v912_v20, %v404_v19 }
  0xc9   : > { %v409_v24 = vmax.f32 %v405_v21, 0.0 }
  0xce   : > { %v406_v22 = vpop.f32.mrf.mxu0 }
  0xcf   : > { %v407_v23 = vadd.f32 %v912_v20, %v406_v22 }
  0xd1   : > { %v410_v25 = vmax.f32 %v407_v23, 0.0 }
  0xd3   : > { %v411_v26 = vpack.c.bf16 %v410_v25, %v409_v24 }
  0xd5   : > { %488 = vmatmul.bf16.vlgmr.msra.gmra.mxu1 %v411_v26 }
 0x152   : > { %v489_v31 = vpop.f32.mrf.mxu1 }
 0x153   : > { %v490_v33 = vadd.f32 %v913_v32, %v489_v31 }
 0x155   : > { %v494_v36 = vmax.f32 %v490_v33, 0.0 }
 0x15a   : > { %v491_v34 = vpop.f32.mrf.mxu1 }
 0x15b   : > { %v492_v35 = vadd.f32 %v913_v32, %v491_v34 }
 0x15d   : > { %v495_v37 = vmax.f32 %v492_v35, 0.0 }
 0x15f   : > { %v496_v38 = vpack.c.bf16 %v495_v37, %v494_v36 }
 0x161   : > { %573 = vmatmul.bf16.vlgmr.msra.gmra.mxu2 %v496_v38 }
 0x1e4   : > { %v574_v39 = vpop.f32.mrf.mxu2 }
 0x1e5   : > { %v575_v42 = vadd.f32 %v914_v40, %v574_v39 }
 0x1ec   : > { %v576_v41 = vpop.f32.mrf.mxu2 }
 0x1ed   : > { %v577_v43 = vadd.f32 %v914_v40, %v576_v41 }
 0x1ef   : > { %v827_v44 = vpack.c.bf16 %v577_v43, %v575_v42 }
 0x1f1   : > { %828 = vst [vmem:[%s348_s15] sm:$0xff] %v827_v44  }
 0x1f2   : > { %1062 = shalt.err (!%p1059_p10)
}
 0x1f3   : > { %s1118_s22 = smov 64   ;;  %s1119_s19 = smov 4  }
 0x1f4   : > { %843 = dma.vmem_to_hbm [thread:$0]  (%p1243_p7), %s597_s16, 128, %s599_s1, %s584_s28, %s1118_s22, %s1118_s22, %s1119_s19  }
 0x1f5 PF: > { %s613_s20 = sand.u32 1, %s1097_s24   ;;  %p1346_p12 = scmp.ge.s32.totalorder %s1109_s27, 2 }
 0x1f6   : > { %s614_s21 = scalar_lea.sflag [#allocation4], %s613_s20 }
 0x1f7   : > { %p860_p13 = pnand %p1346_p12, %p1195_p6 }
 0x1f9   : > { %p861_p0 = pneg %p860_p13 }
 0x1fb   : > { %1092 = dma.done.wait (%p861_p0), %s614_s21, 128  }
 0x1fc   : > { %1094 = vsyncadd (%p861_p0), %s614_s21, 4294967168  ;;  %p22_p3 = scmp.ge.s32.totalorder %s1227_s11, 4   ;;  %s1347_s24 = smov %s1101_s25 }
 0x1fd   : > { %s1348_s25 = smov %s1105_s26  ;;  %s1349_s26 = smov %s1239_s17 }
 0x1fe   : > { %s1350_s27 = smov %s1227_s11  ;;  %24 = sbr.rel (!%p22_p3) target bundleno = 9 (0x9), region = 105 }
 0x203   :  { %620 = vsyncpa [#allocation3], 1 }
 0x204   :  { %622 = vsyncpa [#allocation3 + $0x1], 1 }
 0x205   :  { %623 = vsyncpa [#allocation6], 1 }
 0x206   :  { %624 = vsyncpa [#allocation9], 1 }
 0x207   :  { %625 = vsyncpa [#allocation4], 1 }
 0x208   :  { %627 = vsyncpa [#allocation4 + $0x1], 1 }

</bundles_post_ra>
